<compile_context>
chip_gen: v5e
topology: v5e:2x2
jax: 0.10.0
libtpu: 0.0.40
codegen_flags: <defaults>
</compile_context>

<pallas_src>
import functools
import math

import jax
import jax.numpy as jnp
from jax.experimental import pallas as pl
from jax.experimental.pallas import tpu as pltpu


# Keep double-buffered tiles comfortably under v7x's 64 MiB physical VMEM.
_VMEM_BUDGET = 48 * 1024 * 1024
_VMEM_CAP = 60 * 1024 * 1024


# ------------------------------ tiling helpers ------------------------------ #

def _pick_tile(dim, target, mult):
    """Largest tile <= target that evenly divides dim and is a multiple of
    `mult` (lane/sublane legal); falls back to the full dim (always legal)."""
    if dim <= target:
        return dim
    t = (target // mult) * mult
    while t >= mult:
        if dim % t == 0:
            return t
        t -= mult
    return dim


# ------------------------------- Pallas kernels ----------------------------- #

def _fused_linear_kernel(*refs, ln, bias, gelu, residual):
    """y = [gelu]( layernorm?(x) @ W [+ b] ) [+ residual], f32 accumulation."""
    refs = list(refs)
    x_ref = refs.pop(0)
    if ln:
        g_ref = refs.pop(0)
        bb_ref = refs.pop(0)
    w_ref = refs.pop(0)
    if bias:
        b_ref = refs.pop(0)
    if residual:
        r_ref = refs.pop(0)
    o_ref = refs.pop(0)

    if ln:
        x = x_ref[...].astype(jnp.float32)
        mu = jnp.mean(x, axis=-1, keepdims=True)
        var = jnp.mean(jnp.square(x - mu), axis=-1, keepdims=True)
        x = (x - mu) * jax.lax.rsqrt(var + 1e-5)
        x = x * g_ref[...].astype(jnp.float32) + bb_ref[...].astype(jnp.float32)
        x = x.astype(w_ref.dtype)
    else:
        x = x_ref[...].astype(w_ref.dtype)

    # bf16 operands into the MXU, f32 accumulation.
    y = jnp.dot(x, w_ref[...], preferred_element_type=jnp.float32)
    if bias:
        y = y + b_ref[...].astype(jnp.float32)
    if gelu:
        y = jax.nn.gelu(y, approximate=True)      # tanh form -> EUP, not VALU
    if residual:
        y = y + r_ref[...].astype(jnp.float32)
    o_ref[...] = y.astype(o_ref.dtype)


def _ln_kernel(x_ref, g_ref, b_ref, o_ref):
    x = x_ref[...].astype(jnp.float32)
    mu = jnp.mean(x, axis=-1, keepdims=True)
    var = jnp.mean(jnp.square(x - mu), axis=-1, keepdims=True)
    y = (x - mu) * jax.lax.rsqrt(var + 1e-5)
    y = y * g_ref[...].astype(jnp.float32) + b_ref[...].astype(jnp.float32)
    o_ref[...] = y.astype(o_ref.dtype)


def _flash_attn_kernel(off_ref, q_ref, k_ref, v_ref, o_ref,
                       m_sc, l_sc, acc_sc, *, scale, causal, tk):
    """Online-softmax attention over a block of heads; kv tiles on grid axis 1."""
    kv = pl.program_id(1)
    tq = q_ref.shape[1]

    @pl.when(kv == 0)
    def _():
        m_sc[...] = jnp.full_like(m_sc, -jnp.inf)
        l_sc[...] = jnp.zeros_like(l_sc)
        acc_sc[...] = jnp.zeros_like(acc_sc)

    def update():
        q = q_ref[...]
        kb = k_ref[...]
        vb = v_ref[...]
        # Contract on Dh directly (no explicit K transpose).
        s = jnp.einsum("hqd,hkd->hqk", q, kb,
                       preferred_element_type=jnp.float32) * scale
        if causal:
            off = off_ref[0]
            qpos = off + jax.lax.broadcasted_iota(jnp.int32, (tq, tk), 0)
            kpos = kv * tk + jax.lax.broadcasted_iota(jnp.int32, (tq, tk), 1)
            s = jnp.where((kpos <= qpos)[None], s, -1e30)
        m_prev = m_sc[...]
        m_new = jnp.maximum(m_prev, jnp.max(s, axis=-1, keepdims=True))
        alpha = jnp.exp(m_prev - m_new)
        p = jnp.exp(s - m_new)
        l_sc[...] = alpha * l_sc[...] + jnp.sum(p, axis=-1, keepdims=True)
        acc_sc[...] = alpha * acc_sc[...] + jnp.einsum(
            "hqk,hkd->hqd", p.astype(vb.dtype), vb,
            preferred_element_type=jnp.float32)
        m_sc[...] = m_new

    if causal:
        # Skip key tiles that are entirely in the (masked / stale-cache) future.
        @pl.when(kv * tk <= off_ref[0] + tq - 1)
        def _():
            update()
    else:
        update()

    @pl.when(kv == pl.num_programs(1) - 1)
    def _():
        o_ref[...] = (acc_sc[...] / l_sc[...]).astype(o_ref.dtype)


# ------------------------------ kernel wrappers ----------------------------- #

def fused_linear(x2d, w, b=None, *, ln=None, gelu=False, residual=None,
                 out_dtype=jnp.bfloat16, tm_target=256, tn_target=1024):
    """Tiled (M,N)-grid linear with optional fused layernorm / GELU / residual."""
    M, K = x2d.shape
    N = w.shape[1]
    xi = jnp.dtype(x2d.dtype).itemsize
    wi = jnp.dtype(w.dtype).itemsize
    oi = jnp.dtype(out_dtype).itemsize
    ri = jnp.dtype(residual.dtype).itemsize if residual is not None else 0

    tm_t, tn_t = tm_target, tn_target
    while True:
        tm = _pick_tile(M, tm_t, 8)
        tn = _pick_tile(N, tn_t, 128)
        # double-buffered x / W / out tiles + f32 accumulator temporary
        need = 2 * (tm * K * xi + K * tn * wi + tm * tn * oi) + tm * tn * 4
        if b is not None:
            need += 2 * tn * 4
        if residual is not None:
            need += 2 * tm * tn * ri
        if ln is not None:
            need += 4 * K * 4 + tm * K * 4
        if need <= _VMEM_BUDGET or (tn <= 128 and tm <= 8):
            break
        if tn > 128:
            tn_t = max(128, tn // 2)
        elif tm > 8:
            tm_t = max(8, tm // 2)
        else:
            break
    grid = (M // tm, N // tn)

    in_specs = [pl.BlockSpec((tm, K), lambda i, j: (i, 0))]
    args = [x2d]
    if ln is not None:
        gamma, beta = ln
        in_specs += [pl.BlockSpec((1, K), lambda i, j: (0, 0)),
                     pl.BlockSpec((1, K), lambda i, j: (0, 0))]
        args += [gamma.reshape(1, K), beta.reshape(1, K)]
    in_specs.append(pl.BlockSpec((K, tn), lambda i, j: (0, j)))
    args.append(w)
    if b is not None:
        in_specs.append(pl.BlockSpec((1, tn), lambda i, j: (0, j)))
        args.append(b.reshape(1, N))
    if residual is not None:
        in_specs.append(pl.BlockSpec((tm, tn), lambda i, j: (i, j)))
        args.append(residual)

    kernel = functools.partial(_fused_linear_kernel, ln=ln is not None,
                               bias=b is not None, gelu=gelu,
                               residual=residual is not None)
    return pl.pallas_call(
        kernel,
        out_shape=jax.ShapeDtypeStruct((M, N), out_dtype),
        grid=grid,
        in_specs=in_specs,
        out_specs=pl.BlockSpec((tm, tn), lambda i, j: (i, j)),
        compiler_params=pltpu.CompilerParams(
            dimension_semantics=("parallel", "parallel"),
            vmem_limit_bytes=int(min(need + (8 << 20), _VMEM_CAP))),
    )(*args)


def layernorm(x2d, g, b, *, out_dtype=jnp.bfloat16, tm_target=256):
    """Standalone row-wise layernorm (computed once, not per vocab tile)."""
    M, K = x2d.shape
    tm = _pick_tile(M, tm_target, 8)
    return pl.pallas_call(
        _ln_kernel,
        out_shape=jax.ShapeDtypeStruct((M, K), out_dtype),
        grid=(M // tm,),
        in_specs=[pl.BlockSpec((tm, K), lambda i: (i, 0)),
                  pl.BlockSpec((1, K), lambda i: (0, 0)),
                  pl.BlockSpec((1, K), lambda i: (0, 0))],
        out_specs=pl.BlockSpec((tm, K), lambda i: (i, 0)),
        compiler_params=pltpu.CompilerParams(
            dimension_semantics=("parallel",)),
    )(x2d, g.reshape(1, K), b.reshape(1, K))


def attention(q, k, v, offset_arr, *, scale, causal,
              hpb_target=8, tk_target=512):
    """q: (BH, Tq, Dh); k/v: (BH, Tk, Dh); offset_arr: (1,) int32 -> (BH, Tq, Dh) bf16."""
    BH, Tq, Dh = q.shape
    Tk = k.shape[1]

    hpb_t, tk_t = hpb_target, tk_target
    while True:
        hpb = _pick_tile(BH, hpb_t, 1)
        tk = _pick_tile(Tk, tk_t, 8)
        need = 2 * 2 * (2 * hpb * Tq * Dh + 2 * hpb * tk * Dh)   # q/o + k/v bf16, dbl-buffered
        need += hpb * Tq * (8 + 4 * Dh)                          # m/l/acc f32 scratch
        need += 2 * hpb * Tq * tk * 4                            # s, p f32 temporaries
        if need <= _VMEM_BUDGET or (hpb <= 1 and tk <= 128):
            break
        if tk > 128:
            tk_t = max(128, tk // 2)
        elif hpb > 1:
            hpb_t = max(1, hpb // 2)
        else:
            break
    grid = (BH // hpb, Tk // tk)

    kernel = functools.partial(_flash_attn_kernel, scale=scale,
                               causal=causal, tk=tk)
    grid_spec = pltpu.PrefetchScalarGridSpec(
        num_scalar_prefetch=1,
        grid=grid,
        in_specs=[pl.BlockSpec((hpb, Tq, Dh), lambda h, kv, off: (h, 0, 0)),
                  pl.BlockSpec((hpb, tk, Dh), lambda h, kv, off: (h, kv, 0)),
                  pl.BlockSpec((hpb, tk, Dh), lambda h, kv, off: (h, kv, 0))],
        out_specs=pl.BlockSpec((hpb, Tq, Dh), lambda h, kv, off: (h, 0, 0)),
        scratch_shapes=[pltpu.VMEM((hpb, Tq, 1), jnp.float32),
                        pltpu.VMEM((hpb, Tq, 1), jnp.float32),
                        pltpu.VMEM((hpb, Tq, Dh), jnp.float32)])
    return pl.pallas_call(
        kernel,
        out_shape=jax.ShapeDtypeStruct((BH, Tq, Dh), jnp.bfloat16),
        grid_spec=grid_spec,
        compiler_params=pltpu.CompilerParams(
            dimension_semantics=("parallel", "arbitrary"),
            vmem_limit_bytes=int(min(need + (8 << 20), _VMEM_CAP))),
    )(offset_arr, q, k, v)


# ---------------------------- decoder (JAX glue) ----------------------------- #

class OpenVINOTextDecoder:
    """Pallas-TPU Whisper text decoder matching the OpenVINO wrapper's forward()."""

    def __init__(self, *, vocab, n_ctx, n_state, n_head, n_layer, key):
        self.vocab, self.n_ctx, self.n_state = vocab, n_ctx, n_state
        self.n_head, self.n_layer = n_head, n_layer
        self.dh = n_state // n_head
        # pad the vocab head to a multiple of 512 -> legal, lane-dense N tiling
        self.vocab_padded = ((vocab + 511) // 512) * 512
        std = 0.02
        ks = jax.random.split(key, 2 + n_layer)

        D = n_state
        emb = std * jax.random.normal(ks[0], (vocab, D), jnp.float32)
        self.token_embedding = emb                              # for lookup
        emb_t = emb.T.astype(jnp.bfloat16)                      # (D, vocab), built once
        self.token_embedding_T = jnp.pad(
            emb_t, ((0, 0), (0, self.vocab_padded - vocab)))
        self.positional_embedding = std * jax.random.normal(
            ks[1], (n_ctx, D), jnp.float32)

        def lin_w(k, din, dout):
            return (std * jax.random.normal(k, (din, dout), jnp.float32)
                    ).astype(jnp.bfloat16)

        def lin_b(k, dout):
            return std * jax.random.normal(k, (dout,), jnp.float32)

        zero_d = jnp.zeros((D,), jnp.float32)
        self.blocks = []
        for i in range(n_layer):
            bk = jax.random.split(ks[2 + i], 16)
            blk = dict(
                attn_ln_g=jnp.ones((D,), jnp.float32),
                attn_ln_b=jnp.zeros((D,), jnp.float32),
                # fused Q/K/V projection; Whisper's K projection has no bias
                wqkv=lin_w(bk[0], D, 3 * D),
                bqkv=jnp.concatenate([lin_b(bk[1], D), zero_d, lin_b(bk[2], D)]),
                wo=lin_w(bk[3], D, D), bo=lin_b(bk[4], D),
                xattn_ln_g=jnp.ones((D,), jnp.float32),
                xattn_ln_b=jnp.zeros((D,), jnp.float32),
                wxq=lin_w(bk[5], D, D), bxq=lin_b(bk[6], D),
                # fused cross-attn K/V projection; K has no bias
                wxkv=lin_w(bk[7], D, 2 * D),
                bxkv=jnp.concatenate([zero_d, lin_b(bk[8], D)]),
                wxo=lin_w(bk[9], D, D), bxo=lin_b(bk[10], D),
                mlp_ln_g=jnp.ones((D,), jnp.float32),
                mlp_ln_b=jnp.zeros((D,), jnp.float32),
                w1=lin_w(bk[11], D, 4 * D), b1=lin_b(bk[12], 4 * D),
                w2=lin_w(bk[13], 4 * D, D), b2=lin_b(bk[14], D),
            )
            self.blocks.append(blk)
        self.ln_g = jnp.ones((D,), jnp.float32)
        self.ln_b = jnp.zeros((D,), jnp.float32)

    # -- helpers ------------------------------------------------------------ #
    def _split_heads(self, x):      # (B,T,D) -> (B*H, T, Dh)
        B, T, D = x.shape
        x = x.reshape(B, T, self.n_head, self.dh).transpose(0, 2, 1, 3)
        return x.reshape(B * self.n_head, T, self.dh)

    def _merge_heads(self, x, B):   # (B*H, T, Dh) -> (B, T, D)
        BH, T, Dh = x.shape
        x = x.reshape(B, self.n_head, T, Dh).transpose(0, 2, 1, 3)
        return x.reshape(B, T, self.n_head * Dh)

    # -- forward ------------------------------------------------------------ #
    def forward(self, x, xa, kv_cache=None):
        """x: (B, T) int32 tokens; xa: (B, n_audio_ctx, n_state) float32."""
        B, T = x.shape
        D, H, Dh = self.n_state, self.n_head, self.dh
        M = B * T
        scale = 1.0 / math.sqrt(Dh)
        kv_cache = kv_cache or {}

        # fixed-shape cache: valid length is carried as a traced scalar
        offset = kv_cache.get("cache_len", jnp.asarray(0, jnp.int32))
        offset = jnp.asarray(offset, jnp.int32)
        zero = jnp.asarray(0, jnp.int32)
        off_arr = jnp.reshape(offset, (1,))
        zero_arr = jnp.zeros((1,), jnp.int32)

        pos = jax.lax.dynamic_slice(self.positional_embedding,
                                    (offset, zero), (T, D))
        h2 = (self.token_embedding[x] + pos[None]).reshape(M, D)   # f32 residual stream
        xa_flat = xa.reshape(-1, D).astype(jnp.bfloat16)           # cast once, reused per layer
        Ta = xa.shape[1]

        new_cache = {"cache_len": offset + T}

        for i, blk in enumerate(self.blocks):
            sk = f"decoder.blocks.{i}.attn.key"
            sv = f"decoder.blocks.{i}.attn.value"
            ck = f"decoder.blocks.{i}.cross_attn.key"
            cv = f"decoder.blocks.{i}.cross_attn.value"

            # --- masked self-attention (LN fused into the QKV matmul) --- #
            qkv = fused_linear(h2, blk["wqkv"], blk["bqkv"],
                               ln=(blk["attn_ln_g"], blk["attn_ln_b"]),
                               out_dtype=jnp.bfloat16)
            q, k_new, v_new = jnp.split(qkv, 3, axis=-1)
            q_h = self._split_heads(q.reshape(B, T, D))
            k_h = self._split_heads(k_new.reshape(B, T, D))
            v_h = self._split_heads(v_new.reshape(B, T, D))

            k_cache = kv_cache.get(sk)
            v_cache = kv_cache.get(sv)
            if k_cache is None:
                k_cache = jnp.zeros((B * H, self.n_ctx, Dh), jnp.bfloat16)
                v_cache = jnp.zeros((B * H, self.n_ctx, Dh), jnp.bfloat16)
            k_cache = jax.lax.dynamic_update_slice(k_cache, k_h, (zero, offset, zero))
            v_cache = jax.lax.dynamic_update_slice(v_cache, v_h, (zero, offset, zero))
            new_cache[sk], new_cache[sv] = k_cache, v_cache

            a = attention(q_h, k_cache, v_cache, off_arr,
                          scale=scale, causal=True)
            a2 = self._merge_heads(a, B).reshape(M, D)
            h2 = fused_linear(a2, blk["wo"], blk["bo"], residual=h2,
                              out_dtype=jnp.float32)

            # --- cross-attention over audio features (no mask) --- #
            if ck in kv_cache:
                xk_h, xv_h = kv_cache[ck], kv_cache[cv]
            else:
                xkv = fused_linear(xa_flat, blk["wxkv"], blk["bxkv"],
                                   out_dtype=jnp.bfloat16)
                xk, xv = jnp.split(xkv, 2, axis=-1)
                xk_h = self._split_heads(xk.reshape(B, Ta, D))
                xv_h = self._split_heads(xv.reshape(B, Ta, D))
            new_cache[ck], new_cache[cv] = xk_h, xv_h

            xq = fused_linear(h2, blk["wxq"], blk["bxq"],
                              ln=(blk["xattn_ln_g"], blk["xattn_ln_b"]),
                              out_dtype=jnp.bfloat16)
            a = attention(self._split_heads(xq.reshape(B, T, D)), xk_h, xv_h,
                          zero_arr, scale=scale, causal=False)
            a2 = self._merge_heads(a, B).reshape(M, D)
            h2 = fused_linear(a2, blk["wxo"], blk["bxo"], residual=h2,
                              out_dtype=jnp.float32)

            # --- MLP (LN + fc1 + GELU fused; residual fused into fc2) --- #
            m = fused_linear(h2, blk["w1"], blk["b1"],
                             ln=(blk["mlp_ln_g"], blk["mlp_ln_b"]),
                             gelu=True, out_dtype=jnp.bfloat16)
            h2 = fused_linear(m, blk["w2"], blk["b2"], residual=h2,
                              out_dtype=jnp.float32, tn_target=512)

        # final LN once (not per vocab tile), then padded lane-dense vocab head
        hn = layernorm(h2, self.ln_g, self.ln_b, out_dtype=jnp.bfloat16)
        logits_p = fused_linear(hn, self.token_embedding_T, None,
                                out_dtype=jnp.float32, tn_target=2048)
        logits = logits_p[:, :self.vocab].reshape(B, T, self.vocab)
        return logits, new_cache

    __call__ = forward


# ----------------------------------- main ------------------------------------ #

if __name__ == "__main__":
    key = jax.random.PRNGKey(0)
    kp, kt, ka, kt2 = jax.random.split(key, 4)

    B, T = 2, 8            # beam/batch, prompt tokens
    N_AUDIO_CTX = 16       # encoded audio context length
    N_STATE = 32
    N_HEAD = 4
    N_LAYER = 2
    VOCAB = 64
    N_CTX = 16
    DH = N_STATE // N_HEAD

    decoder = OpenVINOTextDecoder(
        vocab=VOCAB, n_ctx=N_CTX, n_state=N_STATE,
        n_head=N_HEAD, n_layer=N_LAYER, key=kp)

    tokens = jax.random.randint(kt, (B, T), 0, VOCAB, dtype=jnp.int32)
    audio_features = jax.random.normal(ka, (B, N_AUDIO_CTX, N_STATE), jnp.float32)

    # step 1: prompt (no cache)
    logits, kv_cache = decoder(tokens, audio_features, kv_cache=None)
    jax.block_until_ready(logits)
    for vv in kv_cache.values():
        jax.block_until_ready(vv)
    assert logits.shape == (B, T, VOCAB)
    assert bool(jnp.all(jnp.isfinite(logits)))
    assert int(kv_cache["cache_len"]) == T
    assert kv_cache["decoder.blocks.0.attn.key"].shape == (B * N_HEAD, N_CTX, DH)
    assert kv_cache["decoder.blocks.0.cross_attn.key"].shape == (B * N_HEAD, N_AUDIO_CTX, DH)
    assert len(kv_cache) == 4 * N_LAYER + 1

    # step 2: single-token decode using the fixed-shape cache (same shapes -> no recompile)
    next_tok = jax.random.randint(kt2, (B, 1), 0, VOCAB, dtype=jnp.int32)
    logits2, kv_cache2 = decoder(next_tok, audio_features, kv_cache=kv_cache)
    jax.block_until_ready(logits2)
    assert logits2.shape == (B, 1, VOCAB)
    assert bool(jnp.all(jnp.isfinite(logits2)))
    assert int(kv_cache2["cache_len"]) == T + 1
    assert kv_cache2["decoder.blocks.0.attn.key"].shape == (B * N_HEAD, N_CTX, DH)

    print("KERNEL_OK")
</pallas_src>

<mosaic_0001>
module attributes {stable_mosaic.version = 11 : i64} {
  func.func @_fused_linear_kernel(%arg0: i32, %arg1: i32, %arg2: memref<16x32xf32, #tpu.memory_space<vmem>>, %arg3: memref<1x32xf32, #tpu.memory_space<vmem>>, %arg4: memref<1x32xf32, #tpu.memory_space<vmem>>, %arg5: memref<32x96xbf16, #tpu.memory_space<vmem>>, %arg6: memref<1x96xf32, #tpu.memory_space<vmem>>, %arg7: memref<16x96xbf16, #tpu.memory_space<vmem>>) attributes {dimension_semantics = [#tpu.dimension_semantics<parallel>, #tpu.dimension_semantics<parallel>], iteration_bounds = array<i64: 1, 1>, scalar_prefetch = 0 : i64, scratch_operands = 0 : i64, tpu.core_type = #tpu.core_type<tc>, window_params = [{transform_indices = @transform_0, window_bounds = array<i64: 16, 32>}, {pipeline_mode = #tpu.pipeline_mode<synchronous>, transform_indices = @transform_1, window_bounds = array<i64: 1, 32>}, {pipeline_mode = #tpu.pipeline_mode<synchronous>, transform_indices = @transform_2, window_bounds = array<i64: 1, 32>}, {transform_indices = @transform_3, window_bounds = array<i64: 32, 96>}, {transform_indices = @transform_4, window_bounds = array<i64: 1, 96>}, {transform_indices = @transform_5, window_bounds = array<i64: 16, 96>}]} {
    %c0 = arith.constant 0 : index
    %c0_0 = arith.constant 0 : index
    %0 = vector.load %arg2[%c0, %c0_0] : memref<16x32xf32, #tpu.memory_space<vmem>>, vector<16x32xf32>
    %cst = arith.constant dense<0.000000e+00> : vector<16xf32>
    %1 = vector.multi_reduction <add>, %0, %cst [1] : vector<16x32xf32> to vector<16xf32>
    %2 = vector.shape_cast %1 : vector<16xf32> to vector<16x1xf32>
    %cst_1 = arith.constant 3.200000e+01 : f32
    %3 = vector.broadcast %cst_1 : f32 to vector<16x1xf32>
    %4 = arith.divf %2, %3 : vector<16x1xf32>
    %5 = vector.broadcast %4 : vector<16x1xf32> to vector<16x32xf32>
    %6 = arith.subf %0, %5 : vector<16x32xf32>
    %7 = arith.mulf %6, %6 : vector<16x32xf32>
    %cst_2 = arith.constant dense<0.000000e+00> : vector<16xf32>
    %8 = vector.multi_reduction <add>, %7, %cst_2 [1] : vector<16x32xf32> to vector<16xf32>
    %9 = vector.shape_cast %8 : vector<16xf32> to vector<16x1xf32>
    %cst_3 = arith.constant 3.200000e+01 : f32
    %10 = vector.broadcast %cst_3 : f32 to vector<16x1xf32>
    %11 = arith.divf %9, %10 : vector<16x1xf32>
    %12 = vector.broadcast %4 : vector<16x1xf32> to vector<16x32xf32>
    %13 = arith.subf %0, %12 : vector<16x32xf32>
    %cst_4 = arith.constant 9.99999974E-6 : f32
    %14 = vector.broadcast %cst_4 : f32 to vector<16x1xf32>
    %15 = arith.addf %11, %14 : vector<16x1xf32>
    %16 = math.rsqrt %15 : vector<16x1xf32>
    %17 = vector.broadcast %16 : vector<16x1xf32> to vector<16x32xf32>
    %18 = arith.mulf %13, %17 : vector<16x32xf32>
    %c0_5 = arith.constant 0 : index
    %c0_6 = arith.constant 0 : index
    %19 = vector.load %arg3[%c0_5, %c0_6] : memref<1x32xf32, #tpu.memory_space<vmem>>, vector<1x32xf32>
    %20 = vector.broadcast %19 : vector<1x32xf32> to vector<16x32xf32>
    %21 = arith.mulf %18, %20 : vector<16x32xf32>
    %c0_7 = arith.constant 0 : index
    %c0_8 = arith.constant 0 : index
    %22 = vector.load %arg4[%c0_7, %c0_8] : memref<1x32xf32, #tpu.memory_space<vmem>>, vector<1x32xf32>
    %23 = vector.broadcast %22 : vector<1x32xf32> to vector<16x32xf32>
    %24 = arith.addf %21, %23 : vector<16x32xf32>
    %25 = arith.truncf %24 : vector<16x32xf32> to vector<16x32xbf16>
    %c0_9 = arith.constant 0 : index
    %c0_10 = arith.constant 0 : index
    %26 = vector.load %arg5[%c0_9, %c0_10] : memref<32x96xbf16, #tpu.memory_space<vmem>>, vector<32x96xbf16>
    %cst_11 = arith.constant dense<0.000000e+00> : vector<16x96xf32>
    %27 = tpu.matmul %25, %26, %cst_11 {dimension_numbers = #tpu.dot_dimension_numbers<[1], [0], [0], [1], [0, 0, 1, 1], [], []>} : vector<16x32xbf16>, vector<32x96xbf16>, vector<16x96xf32> -> vector<16x96xf32>
    %c0_12 = arith.constant 0 : index
    %c0_13 = arith.constant 0 : index
    %28 = vector.load %arg6[%c0_12, %c0_13] : memref<1x96xf32, #tpu.memory_space<vmem>>, vector<1x96xf32>
    %29 = vector.broadcast %28 : vector<1x96xf32> to vector<16x96xf32>
    %30 = arith.addf %27, %29 : vector<16x96xf32>
    %31 = arith.truncf %30 : vector<16x96xf32> to vector<16x96xbf16>
    %c0_14 = arith.constant 0 : index
    %c0_15 = arith.constant 0 : index
    %32 = vector.load %arg7[%c0_14, %c0_15] : memref<16x96xbf16, #tpu.memory_space<vmem>>, vector<16x96xbf16>
    tpu.vector_store %arg7[%c0_14, %c0_15], %31 {strides = array<i32>} : memref<16x96xbf16, #tpu.memory_space<vmem>>, vector<16x96xbf16>,
    return
  }
  func.func @transform_0(%arg0: i32, %arg1: i32) -> (i32, i32) {
    %c0_i32 = arith.constant 0 : i32
    %c0_i32_0 = arith.constant 0 : i32
    return %arg0, %c0_i32 : i32, i32
  }
  func.func @transform_1(%arg0: i32, %arg1: i32) -> (i32, i32) {
    %c0_i32 = arith.constant 0 : i32
    %c0_i32_0 = arith.constant 0 : i32
    %c0_i32_1 = arith.constant 0 : i32
    return %c0_i32, %c0_i32_0 : i32, i32
  }
  func.func @transform_2(%arg0: i32, %arg1: i32) -> (i32, i32) {
    %c0_i32 = arith.constant 0 : i32
    %c0_i32_0 = arith.constant 0 : i32
    %c0_i32_1 = arith.constant 0 : i32
    return %c0_i32, %c0_i32_0 : i32, i32
  }
  func.func @transform_3(%arg0: i32, %arg1: i32) -> (i32, i32) {
    %c0_i32 = arith.constant 0 : i32
    %c0_i32_0 = arith.constant 0 : i32
    return %c0_i32, %arg1 : i32, i32
  }
  func.func @transform_4(%arg0: i32, %arg1: i32) -> (i32, i32) {
    %c0_i32 = arith.constant 0 : i32
    %c0_i32_0 = arith.constant 0 : i32
    return %c0_i32, %arg1 : i32, i32
  }
  func.func @transform_5(%arg0: i32, %arg1: i32) -> (i32, i32) {
    %c0_i32 = arith.constant 0 : i32
    return %arg0, %arg1 : i32, i32
  }
}

</mosaic_0001>

<bundles_post_ra>
// kernel: tpu_custom_call.1
= control target key start
LH: loop header
LB: loop body
LE: loop exit
PB: predicated region body
PF: predicated region fallthrough
CT: control target
= control target key end

     0   :  { %10 = vsyncpa [#allocation3], 0  ;;  %s395_s0 = inlined_call_operand.hbm [shape: f32[16,32], index: 0, kind: input, shape index: {}]   ;;  %s396_s1 = inlined_call_operand.hbm [shape: f32[1,32], index: 1, kind: input, shape index: {}]   ;;  %s397_s2 = inlined_call_operand.vmem [shape: f32[1,32], index: 2, kind: input, shape index: {}]   ;;  %s398_s3 = inlined_call_operand.hbm [shape: bf16[32,96], index: 3, kind: input, shape index: {}]   ;;  %s399_s4 = inlined_call_operand.vmem [shape: f32[1,96], index: 4, kind: input, shape index: {}]   ;;  %s400_s5 = inlined_call_operand.hbm [shape: bf16[16,96], index: 5, kind: output, shape index: {}]  }
   0x1   :  { %11 = vsyncpa [#allocation6], 0  ;;  %s31_s20 = sshll.u32 %s396_s1, 4  ;;  %s32_s20 = int_to_ptr.hbm [resolvable:$true] %s31_s20 }
   0x2   :  { %12 = vsyncpa [#allocation4], 0  ;;  %s327_s21 = smov [#allocation5]   ;;  %s17_s25 = sshll.u32 %s395_s0, 4  ;;  %s18_s25 = int_to_ptr.hbm [resolvable:$true] %s17_s25 }
   0x3   :  { %s33_s22 = sshll.u32 %s327_s21, 4  ;;  %s328_s26 = smov [#allocation2]   ;;  %s34_s22 = int_to_ptr.vmem [resolvable:$true] %s33_s22 }
   0x4   :  { %36 = dma.hbm_to_vmem [thread:$0]  %s32_s20, 16, %s34_s22, [#allocation6]  }
   0x5   :  { %s19_s27 = sshll.u32 %s328_s26, 4  ;;  %s329_s28 = smov 128   ;;  %s20_s27 = int_to_ptr.vmem [resolvable:$true] %s19_s27 }
   0x6   :  { %s330_s29 = smov 8   ;;  %s43_s1 = sshll.u32 %s398_s3, 4  ;;  %s44_s1 = int_to_ptr.hbm [resolvable:$true] %s43_s1 }
   0x7   :  { %25 = dma.hbm_to_vmem [thread:$0]  %s18_s25, 256, %s20_s27, [#allocation3], %s329_s28, %s329_s28, %s330_s29  }
   0x8   :  { %s331_s7 = smov [#allocation7]   ;;  %s332_s9 = smov 64  }
   0x9   :  { %s45_s8 = sshll.u32 %s331_s7, 4  ;;  %s333_s10 = smov 4   ;;  %s46_s8 = int_to_ptr.vmem [resolvable:$true] %s45_s8 }
   0xa   :  { %51 = dma.hbm_to_vmem [thread:$0]  %s44_s1, 256, %s46_s8, [#allocation6], %s332_s9, %s332_s9, %s333_s10  }
   0xb   :  { %321 = dma.done.wait [#allocation3], 256  }
   0xc   :  { %322 = vsyncadd [#allocation3], 4294967040 }
   0xd   :  { %323 = dma.done.wait [#allocation6], 272  }
   0xe   :  { %324 = vsyncadd [#allocation6], 4294967024  ;;  %vm69_vm0 = vcmask 261120   ;;  %v67_v0 = vld [vmem:[#allocation2] sm:$0xff]  ;;  %v68_v2 = vld [vmem:[#allocation2 + $0x8] sm:$0xff]  ;;  %v334_v4 = vmov 32.0  }
   0xf   :  { %v70_v1 = vsel %vm69_vm0, %v67_v0, 0.0  ;;  %v73_v3 = vsel %vm69_vm0, %v68_v2, 0.0  ;;  %219 = vrcp.f32 %v334_v4  ;;  %v206_v21 = vld [vmem:[#allocation7 + $0x8] sm:$0xff]  ;;  %v205_v23 = vld [vmem:[#allocation7] sm:$0xff]  ;;  %v216_v42 = vld [vmem:[#allocation5] ss:$0 sm:$0xff] }
  0x10   :  { %71 = vadd.xlane.f32.xlu0 %v70_v1  ;;  %163 = vmatpush.bf16.msra.mxu0 %v206_v21  ;;  %v217_v47 = vld [vmem:[%s397_s2] ss:$0 sm:$0xff]  ;;  %vm173_vm8 = vcmask 781312   ;;  %s335_s13 = smov [#allocation8]   ;;  %s182_s16 = sshll.u32 %s400_s5, 4  ;;  %s183_s16 = int_to_ptr.hbm [resolvable:$true] %s182_s16 }
  0x11   :  { %v218_v52 = vld [vmem:[%s399_s4] ss:$0 sm:$0xff]  ;;  %s180_s14 = sshll.u32 %s335_s13, 4  ;;  %s181_s14 = int_to_ptr.vmem [resolvable:$true] %s180_s14 }
  0x14   :  { %164 = vmatpush.bf16.msra.mxu0 %v205_v23 }
  0x15   :  { %v220_v5 = vpop.eup %219 }
  0x16   :  { %v77_v6 = vmul.f32 32.0, %v220_v5  ;;  %vm81_vm1 = vweird.f32 %v220_v5 }
  0x18   :  { %74 = vadd.xlane.f32.xlu0 %v73_v3  ;;  %v78_v7 = vsub.f32 1.0, %v77_v6 }
  0x1a   :  { %v79_v8 = vmul.f32 %v220_v5, %v78_v7 }
  0x1c   :  { %v80_v9 = vadd.f32 %v220_v5, %v79_v8 }
  0x1e   :  { %v82_v10 = vsel %vm81_vm1, %v220_v5, %v80_v9 }
  0x83   :  { %v72_v11 = vpop.xlane.xlu0 %71 }
  0x84   :  { %v83_v12 = vmul.f32 %v82_v10, %v72_v11 }
  0x86   :  { %v85_v13 = vsub.f32 %v67_v0, %v83_v12 }
  0x88   :  { %v87_v14 = vmul.f32 %v85_v13, %v85_v13 }
  0x8a   :  { %v89_v15 = vsel %vm69_vm0, %v87_v14, 0.0 }
  0x8b   :  { %90 = vadd.xlane.f32.xlu1 %v89_v15  ;;  %v75_v16 = vpop.xlane.xlu0 %74 }
  0x8c   :  { %v84_v17 = vmul.f32 %v82_v10, %v75_v16 }
  0x8e   :  { %v86_v18 = vsub.f32 %v68_v2, %v84_v17 }
  0x90   :  { %v88_v19 = vmul.f32 %v86_v18, %v86_v18 }
  0x92   :  { %v92_v20 = vsel %vm69_vm0, %v88_v19, 0.0 }
  0x93   :  { %93 = vadd.xlane.f32.xlu1 %v92_v20 }
  0xfe   :  { %v91_v22 = vpop.xlane.xlu1 %90 }
  0xff   :  { %v95_v24 = vmul.f32 %v91_v22, %v82_v10 }
 0x101   :  { %v97_v25 = vadd.f32 1e-05, %v95_v24 }
 0x103   :  { %221 = vrsqrt.f32 %v97_v25  ;;  %vm105_vm3 = vweird.f32 %v97_v25 }
 0x106   :  { %v94_v26 = vpop.xlane.xlu1 %93 }
 0x107   :  { %v96_v27 = vmul.f32 %v94_v26, %v82_v10 }
 0x109   :  { %v222_v28 = vpop.eup %221  ;;  %v98_v29 = vadd.f32 1e-05, %v96_v27 }
 0x10a   :  { %v100_v30 = vmul.f32 %v222_v28, %v97_v25  ;;  %vm106_vm2 = vweird.f32 %v222_v28 }
 0x10b   :  { %223 = vrsqrt.f32 %v98_v29  ;;  %vm107_vm4 = vmor %vm105_vm3, %vm106_vm2  ;;  %vm115_vm6 = vweird.f32 %v98_v29 }
 0x10c   :  { %v101_v31 = vmul.f32 %v222_v28, %v100_v30 }
 0x10e   :  { %v102_v32 = vmul.f32 0.5, %v101_v31 }
 0x110   :  { %v103_v33 = vsub.f32 1.5, %v102_v32 }
 0x111   :  { %v224_v34 = vpop.eup %223 }
 0x112   :  { %v104_v35 = vmul.f32 %v222_v28, %v103_v33  ;;  %v110_v36 = vmul.f32 %v224_v34, %v98_v29  ;;  %vm116_vm5 = vweird.f32 %v224_v34 }
 0x113   :  { %vm117_vm7 = vmor %vm115_vm6, %vm116_vm5 }
 0x114   :  { %v111_v37 = vmul.f32 %v224_v34, %v110_v36  ;;  %v108_v38 = vsel %vm107_vm4, %v222_v28, %v104_v35 }
 0x115   :  { %v119_v41 = vmul.f32 %v108_v38, %v85_v13 }
 0x116   :  { %v112_v39 = vmul.f32 0.5, %v111_v37 }
 0x117   :  { %v125_v46 = vmul.f32 %v216_v42, %v119_v41 }
 0x118   :  { %v113_v40 = vsub.f32 1.5, %v112_v39 }
 0x119   :  { %v131_v49 = vadd.f32 %v217_v47, %v125_v46 }
 0x11a   :  { %v114_v43 = vmul.f32 %v224_v34, %v113_v40 }
 0x11c   :  { %v118_v44 = vsel %vm117_vm7, %v224_v34, %v114_v43 }
 0x11d   :  { %v120_v45 = vmul.f32 %v118_v44, %v86_v18 }
 0x11f   :  { %v126_v48 = vmul.f32 %v216_v42, %v120_v45 }
 0x121   :  { %v132_v50 = vadd.f32 %v217_v47, %v126_v48 }
 0x123   :  { %v133_v51 = vpack.c.bf16 %v132_v50, %v131_v49 }
 0x125   :  { %204 = vmatmul.msk.bf16.vlgmr.msra.gmra.mxu0 %vm69_vm0, %v133_v51 }
 0x1a2   :  { %v166_v53 = vpop.f32.mrf.mxu0 }
 0x1a3   :  { %v167_v54 = vadd.f32 %v218_v52, %v166_v53 }
 0x1a5   :  { %v171_v55 = vpack.c.bf16 %v167_v54, %v167_v54 }
 0x1a7   :  { %174 = vst.msk [vmem:[#allocation8] sm:$0xf] %vm173_vm8, %v171_v55 }
 0x1aa   :  { %v168_v56 = vpop.f32.mrf.mxu0 }
 0x1ab   :  { %v169_v57 = vadd.f32 %v218_v52, %v168_v56 }
 0x1ad   :  { %v172_v58 = vpack.c.bf16 %v169_v57, %v169_v57 }
 0x1af   :  { %175 = vst.msk [vmem:[#allocation8 + $0x4] sm:$0xf] %vm173_vm8, %v172_v58 }
 0x1b0   :  { %188 = dma.vmem_to_hbm [thread:$0]  %s181_s14, 128, %s183_s16, [#allocation4], %s332_s9, %s332_s9, %s333_s10  }
 0x1b1   :  { %325 = dma.done.wait [#allocation4], 128  }
 0x1b2   :  { %326 = vsyncadd [#allocation4], 4294967168 }
 0x1b3   :  { %193 = vsyncpa [#allocation3], 1 }
 0x1b4   :  { %194 = vsyncpa [#allocation6], 1 }
 0x1b5   :  { %195 = vsyncpa [#allocation4], 1 }

</bundles_post_ra>
